<compile_context>
chip_gen: v7x
topology: tpu7x:2x2x1
jax: 0.10.0
libtpu: 0.0.40
codegen_flags: <defaults>
</compile_context>

<pallas_src>
import functools
import math

import jax
import jax.numpy as jnp
from jax.experimental import pallas as pl
from jax.experimental.pallas import tpu as pltpu

LANES = 128
MAX_TM_REDUCE = 4096   # rows per tile for the partial-sum (reduce=True) path
MAX_TM_MAP = 2048      # rows per tile for the per-element (reduce=False) path
_EXP_NEG_100 = math.exp(-100.0)   # torch clamps log() at -100


def _focal_elementwise(x, t, *, alpha, gamma, logits, binary_targets):
    """Per-element focal loss in f32 (VPU/EUP only, no cross-lane work)."""
    x = x.astype(jnp.float32)
    t = t.astype(jnp.float32)
    if logits:
        # Stable binary_cross_entropy_with_logits.
        bce = jnp.maximum(x, 0.0) - x * t + jnp.log1p(jnp.exp(-jnp.abs(x)))
        pt = jnp.exp(-bce)
    elif binary_targets:
        # Exact for t in {0,1}: pick the true-class probability once, take a
        # single log for BCE and recover pt algebraically (saves one log and
        # one exp per element on the single EUP slot -- the v7x bottleneck).
        p_true = jnp.where(t >= 0.5, x, 1.0 - x)
        bce = -jnp.maximum(jnp.log(p_true), -100.0)
        pt = jnp.maximum(p_true, jnp.float32(_EXP_NEG_100))
    else:
        # binary_cross_entropy on probabilities; torch clamps log at -100.
        log_p = jnp.maximum(jnp.log(x), -100.0)
        log_1mp = jnp.maximum(jnp.log(1.0 - x), -100.0)
        # -(t*log_p + (1-t)*log_1mp) refactored to a single multiply.
        bce = -(log_1mp + t * (log_p - log_1mp))
        pt = jnp.exp(-bce)

    one_m_pt = 1.0 - pt
    g = float(gamma)
    if g == int(g) and 0 <= int(g) <= 8:
        # Integer gamma -> repeated multiplies (no pow = exp(g*log) on EUP).
        n = int(g)
        if n == 0:
            f_loss = bce
        else:
            mod = one_m_pt
            for _ in range(n - 1):
                mod = mod * one_m_pt
            f_loss = mod * bce
    else:
        f_loss = (one_m_pt ** jnp.float32(g)) * bce

    if float(alpha) != 1.0:
        f_loss = jnp.float32(alpha) * f_loss
    return f_loss


def _partial_sum(f_loss):
    """(TM,128) f32 -> (8,128) partial sum via tile-aligned vector adds."""
    tm = f_loss.shape[0]
    return jnp.sum(f_loss.reshape(tm // 8, 8, LANES), axis=0)


def _focal_sum_kernel(x_ref, t_ref, o_ref, *, alpha, gamma, logits,
                      binary_targets, tm, grid_m, total):
    """Writes an (8,128) partial sum for this tile; masks the ragged tail."""
    f = _focal_elementwise(x_ref[...], t_ref[...], alpha=alpha, gamma=gamma,
                           logits=logits, binary_targets=binary_targets)
    valid_last = total - (grid_m - 1) * tm * LANES   # static Python int
    if valid_last == tm * LANES:
        # Perfectly tiled: no masking anywhere.
        o_ref[...] = _partial_sum(f)
    else:
        is_last = pl.program_id(0) == grid_m - 1

        @pl.when(jnp.logical_not(is_last))
        def _():
            o_ref[...] = _partial_sum(f)

        @pl.when(is_last)
        def _():
            # Static tail mask: only the last grid step pays for it.
            row = jax.lax.broadcasted_iota(jnp.int32, (tm, LANES), 0)
            lane = jax.lax.broadcasted_iota(jnp.int32, (tm, LANES), 1)
            in_bounds = row * LANES + lane < valid_last
            o_ref[...] = _partial_sum(jnp.where(in_bounds, f, 0.0))


def _focal_map_kernel(x_ref, t_ref, o_ref, *, alpha, gamma, logits,
                      binary_targets):
    """reduce=False path: per-element focal loss in the input dtype."""
    f = _focal_elementwise(x_ref[...], t_ref[...], alpha=alpha, gamma=gamma,
                           logits=logits, binary_targets=binary_targets)
    o_ref[...] = f.astype(o_ref.dtype)


def _sublane_quantum(*dtypes):
    """Sublane tiling quantum covering every streamed dtype (8/16/32)."""
    q = 8
    for dt in dtypes:
        q = max(q, 32 // jnp.dtype(dt).itemsize)
    return q


def focal_loss(inputs, targets, *, alpha=1.0, gamma=2.0, logits=False,
               reduce=True, binary_targets=False):
    """Pallas FocalLoss forward. Matches the PyTorch module's semantics.

    binary_targets=True enables an exact fast path for {0,1} targets (fewer
    EUP transcendentals, bf16 target stream); leave False for soft targets.
    """
    assert inputs.shape == targets.shape
    total = int(inputs.size)

    x = jnp.ravel(inputs)          # native dtype; f32 cast happens in-kernel
    t = jnp.ravel(targets)
    if binary_targets and jnp.dtype(t.dtype).itemsize > 2:
        # Exact for {0,1} targets; halves the target HBM stream (v5e/v6e).
        t = t.astype(jnp.bfloat16)

    quantum = _sublane_quantum(x.dtype, t.dtype)
    rows = max(pl.cdiv(total, LANES), quantum)       # lane-dense row count
    pad = rows * LANES - total
    if pad:
        # Only a sub-tile tail is ever padded (never rounded up to TM); the
        # padded values are masked / discarded, so the constant is irrelevant.
        x = jnp.pad(x, (0, pad))
        t = jnp.pad(t, (0, pad))
    x2 = x.reshape(rows, LANES)
    t2 = t.reshape(rows, LANES)

    max_tm = MAX_TM_REDUCE if reduce else MAX_TM_MAP
    tm = min(max_tm, (rows // quantum) * quantum)    # block never exceeds rows
    grid_m = pl.cdiv(rows, tm)

    in_specs = [pl.BlockSpec((tm, LANES), lambda i: (i, 0)),
                pl.BlockSpec((tm, LANES), lambda i: (i, 0))]
    params = dict(alpha=float(alpha), gamma=float(gamma), logits=bool(logits),
                  binary_targets=bool(binary_targets))
    # Double-buffered input working set (explicit VMEM limit with headroom).
    in_bytes = 2 * tm * LANES * (jnp.dtype(x.dtype).itemsize
                                 + jnp.dtype(t.dtype).itemsize)

    if reduce:
        out_bytes = 2 * 8 * LANES * 4
        partials = pl.pallas_call(
            functools.partial(_focal_sum_kernel, tm=tm, grid_m=grid_m,
                              total=total, **params),
            out_shape=jax.ShapeDtypeStruct((grid_m * 8, LANES), jnp.float32),
            grid_spec=pltpu.PrefetchScalarGridSpec(
                num_scalar_prefetch=0,
                grid=(grid_m,),
                in_specs=in_specs,
                out_specs=pl.BlockSpec((8, LANES), lambda i: (i, 0)),
            ),
            compiler_params=pltpu.CompilerParams(
                dimension_semantics=("parallel",),
                vmem_limit_bytes=int(in_bytes + out_bytes + (8 << 20))),
        )(x2, t2)
        # Tiny cross-lane reduction + mean outside the kernel.
        loss = jnp.sum(partials) / jnp.float32(total)
        return loss.astype(inputs.dtype)

    # reduce=False: per-element F_loss, written in the input dtype.
    out_dtype = inputs.dtype
    out_bytes = 2 * tm * LANES * jnp.dtype(out_dtype).itemsize
    f = pl.pallas_call(
        functools.partial(_focal_map_kernel, **params),
        out_shape=jax.ShapeDtypeStruct((rows, LANES), out_dtype),
        grid_spec=pltpu.PrefetchScalarGridSpec(
            num_scalar_prefetch=0,
            grid=(grid_m,),
            in_specs=in_specs,
            out_specs=pl.BlockSpec((tm, LANES), lambda i: (i, 0)),
        ),
        compiler_params=pltpu.CompilerParams(
            dimension_semantics=("parallel",),
            vmem_limit_bytes=int(in_bytes + out_bytes + (8 << 20))),
    )(x2, t2)
    if pad == 0:
        return f.reshape(inputs.shape)       # no trailing slice copy
    return jnp.ravel(f)[:total].reshape(inputs.shape)


def _focal_loss_ref(inputs, targets, alpha=1.0, gamma=2.0, logits=False,
                    reduce=True):
    """Pure-JAX port of the PyTorch module's forward."""
    x = inputs.astype(jnp.float32)
    t = targets.astype(jnp.float32)
    if logits:
        bce = jnp.maximum(x, 0.0) - x * t + jnp.log1p(jnp.exp(-jnp.abs(x)))
    else:
        bce = -(t * jnp.maximum(jnp.log(x), -100.0)
                + (1.0 - t) * jnp.maximum(jnp.log(1.0 - x), -100.0))
    pt = jnp.exp(-bce)
    f = alpha * (1.0 - pt) ** gamma * bce
    return jnp.mean(f) if reduce else f


if __name__ == "__main__":
    key = jax.random.PRNGKey(0)
    k1, k2 = jax.random.split(key)
    # Probabilities in (0, 1) and binary targets, NCHW shape (2, 4, 16, 16).
    inputs = jax.random.uniform(k1, (2, 4, 16, 16), jnp.float32,
                                minval=0.01, maxval=0.99)
    targets = (jax.random.uniform(k2, (2, 4, 16, 16)) > 0.5).astype(jnp.float32)

    # reduce=True (module default): scalar mean focal loss.
    out = jax.block_until_ready(focal_loss(inputs, targets))
    ref = _focal_loss_ref(inputs, targets)
    assert jnp.allclose(out, ref, rtol=1e-4, atol=1e-6), (out, ref)

    # Binary-target fast path (1 transcendental/elem, bf16 target stream).
    out_fast = jax.block_until_ready(
        focal_loss(inputs, targets, binary_targets=True))
    assert jnp.allclose(out_fast, ref, rtol=1e-4, atol=1e-6), (out_fast, ref)

    # reduce=False: per-element focal loss in the input dtype.
    out_map = jax.block_until_ready(focal_loss(inputs, targets, reduce=False))
    ref_map = _focal_loss_ref(inputs, targets, reduce=False)
    assert out_map.dtype == inputs.dtype
    assert jnp.allclose(out_map, ref_map, rtol=1e-4, atol=1e-6)

    # Ragged, non-lane-aligned shape exercising the in-kernel tail mask.
    k3, k4 = jax.random.split(k1)
    xr = jax.random.uniform(k3, (3, 5, 7), jnp.float32, minval=0.01, maxval=0.99)
    tr = (jax.random.uniform(k4, (3, 5, 7)) > 0.5).astype(jnp.float32)
    out_r = jax.block_until_ready(focal_loss(xr, tr))
    ref_r = _focal_loss_ref(xr, tr)
    assert jnp.allclose(out_r, ref_r, rtol=1e-4, atol=1e-6), (out_r, ref_r)
    out_rm = jax.block_until_ready(focal_loss(xr, tr, reduce=False))
    ref_rm = _focal_loss_ref(xr, tr, reduce=False)
    assert jnp.allclose(out_rm, ref_rm, rtol=1e-4, atol=1e-6)

    print("KERNEL_OK")
</pallas_src>

<mosaic_0001>
module attributes {stable_mosaic.version = 11 : i64} {
  func.func @_focal_sum_kernel(%arg0: i32, %arg1: memref<16x128xf32, #tpu.memory_space<vmem>>, %arg2: memref<16x128xf32, #tpu.memory_space<vmem>>, %arg3: memref<8x128xf32, #tpu.memory_space<vmem>>) attributes {dimension_semantics = [#tpu.dimension_semantics<parallel>], iteration_bounds = array<i64: 1>, scalar_prefetch = 0 : i64, scratch_operands = 0 : i64, tpu.core_type = #tpu.core_type<tc>, window_params = [{transform_indices = @transform_0, window_bounds = array<i64: 16, 128>}, {transform_indices = @transform_1, window_bounds = array<i64: 16, 128>}, {transform_indices = @transform_2, window_bounds = array<i64: 8, 128>}]} {
    %c0 = arith.constant 0 : index
    %c0_0 = arith.constant 0 : index
    %0 = vector.load %arg1[%c0, %c0_0] : memref<16x128xf32, #tpu.memory_space<vmem>>, vector<16x128xf32>
    %c0_1 = arith.constant 0 : index
    %c0_2 = arith.constant 0 : index
    %1 = vector.load %arg2[%c0_1, %c0_2] : memref<16x128xf32, #tpu.memory_space<vmem>>, vector<16x128xf32>
    %2 = math.log %0 : vector<16x128xf32>
    %cst = arith.constant -1.000000e+02 : f32
    %3 = vector.broadcast %cst : f32 to vector<16x128xf32>
    %4 = arith.maximumf %2, %3 : vector<16x128xf32>
    %cst_3 = arith.constant 1.000000e+00 : f32
    %5 = vector.broadcast %cst_3 : f32 to vector<16x128xf32>
    %6 = arith.subf %5, %0 : vector<16x128xf32>
    %7 = math.log %6 : vector<16x128xf32>
    %cst_4 = arith.constant -1.000000e+02 : f32
    %8 = vector.broadcast %cst_4 : f32 to vector<16x128xf32>
    %9 = arith.maximumf %7, %8 : vector<16x128xf32>
    %10 = arith.subf %4, %9 : vector<16x128xf32>
    %11 = arith.mulf %1, %10 : vector<16x128xf32>
    %12 = arith.addf %9, %11 : vector<16x128xf32>
    %cst_5 = arith.constant 0.000000e+00 : f32
    %13 = vector.broadcast %cst_5 : f32 to vector<16x128xf32>
    %14 = arith.subf %13, %12 : vector<16x128xf32>
    %cst_6 = arith.constant 0.000000e+00 : f32
    %15 = vector.broadcast %cst_6 : f32 to vector<16x128xf32>
    %16 = arith.subf %15, %14 : vector<16x128xf32>
    %17 = math.exp %16 : vector<16x128xf32>
    %cst_7 = arith.constant 1.000000e+00 : f32
    %18 = vector.broadcast %cst_7 : f32 to vector<16x128xf32>
    %19 = arith.subf %18, %17 : vector<16x128xf32>
    %20 = arith.mulf %19, %19 : vector<16x128xf32>
    %21 = arith.mulf %20, %14 : vector<16x128xf32>
    %22 = vector.shape_cast %21 : vector<16x128xf32> to vector<2x8x128xf32>
    %cst_8 = arith.constant dense<0.000000e+00> : vector<8x128xf32>
    %23 = vector.multi_reduction <add>, %22, %cst_8 [0] : vector<2x8x128xf32> to vector<8x128xf32>
    %c0_9 = arith.constant 0 : index
    %c0_10 = arith.constant 0 : index
    %24 = vector.load %arg3[%c0_9, %c0_10] : memref<8x128xf32, #tpu.memory_space<vmem>>, vector<8x128xf32>
    tpu.vector_store %arg3[%c0_9, %c0_10], %23 {strides = array<i32>} : memref<8x128xf32, #tpu.memory_space<vmem>>, vector<8x128xf32>,
    return
  }
  func.func @transform_0(%arg0: i32) -> (i32, i32) {
    %c0_i32 = arith.constant 0 : i32
    %c0_i32_0 = arith.constant 0 : i32
    return %arg0, %c0_i32 : i32, i32
  }
  func.func @transform_1(%arg0: i32) -> (i32, i32) {
    %c0_i32 = arith.constant 0 : i32
    %c0_i32_0 = arith.constant 0 : i32
    return %arg0, %c0_i32 : i32, i32
  }
  func.func @transform_2(%arg0: i32) -> (i32, i32) {
    %c0_i32 = arith.constant 0 : i32
    %c0_i32_0 = arith.constant 0 : i32
    return %arg0, %c0_i32 : i32, i32
  }
}

</mosaic_0001>

<bundles_post_ra>
// kernel: tpu_custom_call.1
= control target key start
LH: loop header
LB: loop body
LE: loop exit
PB: predicated region body
PF: predicated region fallthrough
CT: control target
= control target key end

     0   :  { %7 = vsyncpa [#allocation3], 0  ;;  %s241_s0 = inlined_call_operand.hbm [shape: f32[16,128], index: 0, kind: input, shape index: {}]   ;;  %s242_s1 = inlined_call_operand.hbm [shape: f32[16,128], index: 1, kind: input, shape index: {}]   ;;  %s243_s2 = inlined_call_operand.hbm [shape: f32[8,128], index: 2, kind: output, shape index: {}]  }
   0x1   :  { %8 = vsyncpa [#allocation6], 0 }
   0x2   :  { %9 = vsyncpa [#allocation4], 0  ;;  %s185_s9 = smov [#allocation2]   ;;  %s113_s13 = scalar_lea.hbm %s241_s0, 256 }
   0x3   :  { %s15_s10 = sshll.u32 %s185_s9, 4  ;;  %p114_p0 = scmp.ne.s32.totalorder %s241_s0, %s113_s13  ;;  %s16_s10 = int_to_ptr.vmem [resolvable:$true] %s15_s10 }
   0x4   :  { %p117_p1 = scmp.lt.u32.totalorder %s113_s13, %s241_s0 }
   0x6   :  { %p119_p2 = pnand %p117_p1, %p114_p0 }
   0x8   :  { %122 = shalt.err (!%p119_p2)
}
   0x9   :  { %s123_s18 = scalar_lea.vmem %s16_s10, 256  ;;  %p128_p4 = scmp.lt.s32.totalorder %s16_s10, %s16_s10 }
   0xa   :  { %p124_p3 = scmp.ne.s32.totalorder %s16_s10, %s123_s18  ;;  %p129_p5 = scmp.lt.s32.totalorder %s123_s18, %s123_s18 }
   0xc   :  { %p130_p6 = por %p129_p5, %p128_p4 }
   0xe   :  { %p131_p7 = pnand %p130_p6, %p124_p3 }
  0x10   :  { %134 = shalt.err (!%p131_p7)
}
  0x11   :  { %s186_s19 = smov 128   ;;  %s187_s20 = smov 8  }
  0x12   :  { %21 = dma.hbm_to_vmem [thread:$0]  %s241_s0, 256, %s16_s10, [#allocation3], %s186_s19, %s186_s19, %s187_s20  }
  0x13   :  { %s188_s23 = smov [#allocation5]   ;;  %s135_s27 = scalar_lea.hbm %s242_s1, 256 }
  0x14   :  { %s27_s24 = sshll.u32 %s188_s23, 4  ;;  %p136_p8 = scmp.ne.s32.totalorder %s242_s1, %s135_s27  ;;  %s28_s24 = int_to_ptr.vmem [resolvable:$true] %s27_s24 }
  0x15   :  { %p139_p9 = scmp.lt.u32.totalorder %s135_s27, %s242_s1 }
  0x17   :  { %p141_p10 = pnand %p139_p9, %p136_p8 }
  0x19   :  { %144 = shalt.err (!%p141_p10)
}
  0x1a   :  { %s145_s4 = scalar_lea.vmem %s28_s24, 256  ;;  %p150_p12 = scmp.lt.s32.totalorder %s28_s24, %s28_s24 }
  0x1b   :  { %p146_p11 = scmp.ne.s32.totalorder %s28_s24, %s145_s4  ;;  %p151_p13 = scmp.lt.s32.totalorder %s145_s4, %s145_s4 }
  0x1d   :  { %p152_p0 = por %p151_p13, %p150_p12 }
  0x1f   :  { %p153_p1 = pnand %p152_p0, %p146_p11 }
  0x21   :  { %156 = shalt.err (!%p153_p1)
}
  0x22   :  { %33 = dma.hbm_to_vmem [thread:$0]  %s242_s1, 256, %s28_s24, [#allocation6], %s186_s19, %s186_s19, %s187_s20  }
  0x23   :  { %179 = dma.done.wait [#allocation3], 256  }
  0x24   :  { %180 = vsyncadd [#allocation3], 4294967040 }
  0x25   :  { %181 = dma.done.wait [#allocation6], 256  }
  0x26   :  { %182 = vsyncadd [#allocation6], 4294967040  ;;  %v40_v0 = vld [vmem:[#allocation2] sm:$0xff]  ;;  %v41_v1 = vld [vmem:[#allocation2 + $0x8] sm:$0xff]  ;;  %s189_s1 = smov [#allocation7]  }
  0x27   :  { %101 = vlog2.f32 %v40_v0  ;;  %v50_v2 = vsub.f32 1.0, %v40_v0  ;;  %v51_v3 = vsub.f32 1.0, %v41_v1  ;;  %v42_v15 = vld [vmem:[#allocation5] sm:$0xff]  ;;  %v43_v17 = vld [vmem:[#allocation5 + $0x8] sm:$0xff]  ;;  %s86_s6 = sshll.u32 %s189_s1, 4  ;;  %s87_s6 = int_to_ptr.vmem [resolvable:$true] %s86_s6 }
  0x28   :  { %103 = vlog2.f32 %v41_v1  ;;  %s157_s7 = scalar_lea.vmem %s87_s6, 128  ;;  %p162_p3 = scmp.lt.s32.totalorder %s87_s6, %s87_s6 }
  0x29   :  { %105 = vlog2.f32 %v50_v2  ;;  %p158_p2 = scmp.ne.s32.totalorder %s87_s6, %s157_s7  ;;  %p163_p4 = scmp.lt.s32.totalorder %s157_s7, %s157_s7 }
  0x2a   :  { %107 = vlog2.f32 %v51_v3 }
  0x2b   :  { %p164_p5 = por %p163_p4, %p162_p3 }
  0x2d   :  { %p165_p6 = pnand %p164_p5, %p158_p2 }
  0x31   :  { %v102_v4 = vpop.eup %101 }
  0x32   :  { %v104_v5 = vpop.eup %103  ;;  %v45_v6 = vmul.f32 0.6931472, %v102_v4 }
  0x33   :  { %v106_v7 = vpop.eup %105  ;;  %v47_v8 = vmul.f32 0.6931472, %v104_v5 }
  0x34   :  { %v108_v9 = vpop.eup %107  ;;  %v48_v10 = vmax.f32 %v45_v6, -100.0  ;;  %v53_v11 = vmul.f32 0.6931472, %v106_v7 }
  0x35   :  { %v49_v12 = vmax.f32 %v47_v8, -100.0  ;;  %v55_v13 = vmul.f32 0.6931472, %v108_v9 }
  0x36   :  { %v56_v14 = vmax.f32 %v53_v11, -100.0 }
  0x37   :  { %v57_v16 = vmax.f32 %v55_v13, -100.0 }
  0x38   :  { %v58_v18 = vsub.f32 %v48_v10, %v56_v14 }
  0x39   :  { %v59_v19 = vsub.f32 %v49_v12, %v57_v16 }
  0x3a   :  { %v60_v20 = vmul.f32 %v58_v18, %v42_v15 }
  0x3b   :  { %v61_v21 = vmul.f32 %v59_v19, %v43_v17 }
  0x3c   :  { %v62_v22 = vadd.f32 %v60_v20, %v56_v14 }
  0x3d   :  { %v63_v23 = vadd.f32 %v61_v21, %v57_v16 }
  0x3e   :  { %v64_v24 = vsub.f32 0.0, %v62_v22 }
  0x3f   :  { %v65_v25 = vsub.f32 0.0, %v63_v23 }
  0x40   :  { %v66_v26 = vsub.f32 0.0, %v64_v24 }
  0x41   :  { %v67_v27 = vsub.f32 0.0, %v65_v25 }
  0x42   :  { %v68_v28 = vmul.f32 1.442695, %v66_v26 }
  0x43   :  { %v70_v29 = vmul.f32 1.442695, %v67_v27 }
  0x44   :  { %109 = vpow2.f32 %v68_v28 }
  0x45   :  { %111 = vpow2.f32 %v70_v29 }
  0x4e   :  { %v110_v30 = vpop.eup %109 }
  0x4f   :  { %v112_v31 = vpop.eup %111  ;;  %v72_v32 = vsub.f32 1.0, %v110_v30 }
  0x50   :  { %v73_v33 = vsub.f32 1.0, %v112_v31 }
  0x51   :  { %v74_v34 = vmul.f32 %v72_v32, %v72_v32 }
  0x52   :  { %v75_v35 = vmul.f32 %v73_v33, %v73_v33 }
  0x53   :  { %v76_v36 = vmul.f32 %v74_v34, %v64_v24 }
  0x54   :  { %v77_v37 = vmul.f32 %v75_v35, %v65_v25 }
  0x56   :  { %v78_v38 = vadd.f32 %v77_v37, %v76_v36 }
  0x58   :  { %79 = vst [vmem:[#allocation7] sm:$0xff] %v78_v38 }
  0x59   :  { %168 = shalt.err (!%p165_p6)
}
  0x5a   :  { %s169_s10 = scalar_lea.hbm %s243_s2, 128 }
  0x5b   :  { %p170_p7 = scmp.ne.s32.totalorder %s243_s2, %s169_s10  ;;  %p173_p8 = scmp.lt.u32.totalorder %s169_s10, %s243_s2 }
  0x5d   :  { %p175_p9 = pnand %p173_p8, %p170_p7 }
  0x5f   :  { %178 = shalt.err (!%p175_p9)
}
  0x60   :  { %89 = dma.vmem_to_hbm [thread:$0]  %s87_s6, 128, %s243_s2, [#allocation4]  }
  0x61   :  { %183 = dma.done.wait [#allocation4], 128  }
  0x62   :  { %184 = vsyncadd [#allocation4], 4294967168 }
  0x63   :  { %93 = vsyncpa [#allocation3], 1 }
  0x64   :  { %94 = vsyncpa [#allocation6], 1 }
  0x65   :  { %95 = vsyncpa [#allocation4], 1 }

</bundles_post_ra>
